<compile_context>
chip_gen: v7x
topology: tpu7x:2x2x1
jax: 0.10.0
libtpu: 0.0.40
codegen_flags: <defaults>
</compile_context>

<pallas_src>
import functools

import jax
import jax.numpy as jnp
from jax.experimental import pallas as pl
from jax.experimental.pallas import tpu as pltpu


def _round_up(n, m):
    return (n + m - 1) // m * m


def _pad_to(a, shape):
    pads = [(0, t - s) for s, t in zip(a.shape, shape)]
    if all(p == (0, 0) for p in pads):
        return a
    return jnp.pad(a, pads)


def _modulated_mlp_kernel(x_ref, shift_ref, scale_ref, w1_ref, b1_ref,
                          wo_ref, bo_ref, o_ref, *, eps, h_true):
    # Shapes after the leading batch dim is squeezed:
    #   x_ref:            (TS, Cin_p)   matmul dtype
    #   shift/scale_ref:  (1,  H_p)     f32
    #   w1_ref:           (Cin_p, H_p)  matmul dtype;  b1_ref: (1, H_p)  f32
    #   wo_ref:           (H_p, Cout_p) matmul dtype;  bo_ref: (1, Cout_p) f32
    #   o_ref:            (TS, Cout_p)

    # x = self.linear(x)   (f32 accumulation on the MXU)
    h = jnp.dot(x_ref[...], w1_ref[...],
                preferred_element_type=jnp.float32) + b1_ref[...]      # (TS, H_p)

    # LayerNorm(H, elementwise_affine=False, eps) over the true hidden width.
    # Padded h columns are exactly zero by construction (zero-padded weights
    # and bias), so only the centered term needs a lane mask.
    hp = h.shape[-1]
    inv_h = 1.0 / float(h_true)
    mean = jnp.sum(h, axis=-1, keepdims=True) * inv_h
    hc = h - mean
    if h_true != hp:
        mask = (jax.lax.broadcasted_iota(jnp.int32, (1, hp), 1)
                < h_true).astype(jnp.float32)
        hc = hc * mask
    var = jnp.sum(hc * hc, axis=-1, keepdims=True) * inv_h
    hn = hc * jax.lax.rsqrt(var + eps)

    # modulate(x, shift, scale) = x * (1 + scale) + shift  (broadcast over rows)
    hm = hn * (1.0 + scale_ref[...]) + shift_ref[...]                  # (TS, H_p)

    # self.output (num_layers=1): Linear(H, Cout)
    out = jnp.dot(hm.astype(wo_ref.dtype), wo_ref[...],
                  preferred_element_type=jnp.float32) + bo_ref[...]    # (TS, Cout_p)
    o_ref[...] = out.astype(o_ref.dtype)


def modulated_mlp_pallas(x, c, params, *, eps=1e-6,
                         matmul_dtype=jnp.bfloat16, token_tile=512):
    """x: (B, S, Cin), c: (B, 1, Ccond). Returns (B, S, Cout) in x.dtype."""
    B, S, Cin = x.shape
    w1, b1 = params["w1"], params["b1"]          # (Cin, H), (H,)
    wc, bc = params["wc"], params["bc"]          # (Ccond, H), (H,)
    wm, bm = params["wm"], params["bm"]          # (H, 2H), (2H,)
    wo, bo = params["wo"], params["bo"]          # (H, Cout), (Cout,)
    H = w1.shape[1]
    Cout = wo.shape[1]

    # ---- condition / adaLN path in plain JAX (M=1 matmuls; keeps wm out of VMEM)
    c2 = c.reshape(B, -1).astype(jnp.float32)                # c.squeeze(1)
    cm = c2 @ wc + bc                                        # condition_mapping
    cm = cm * jax.nn.sigmoid(cm)                             # SiLU
    mod = cm @ wm + bm                                       # adaLN Linear(H, 2H)
    shift, scale = mod[:, :H], mod[:, H:]                    # chunk(2, dim=-1)

    # ---- lane-dense padding of channel dims
    Cin_p = _round_up(Cin, 128)
    H_p = _round_up(H, 128)
    Cout_p = _round_up(Cout, 128)

    # ---- token-axis tiling
    TS = min(_round_up(token_tile, 8), _round_up(S, 8))
    S_p = _round_up(S, TS)

    x_p = _pad_to(x, (B, S_p, Cin_p)).astype(matmul_dtype)
    w1_p = _pad_to(w1, (Cin_p, H_p)).astype(matmul_dtype)
    wo_p = _pad_to(wo, (H_p, Cout_p)).astype(matmul_dtype)
    b1_p = _pad_to(b1.reshape(1, H), (1, H_p)).astype(jnp.float32)
    bo_p = _pad_to(bo.reshape(1, Cout), (1, Cout_p)).astype(jnp.float32)
    shift_p = _pad_to(shift.reshape(B, 1, H), (B, 1, H_p)).astype(jnp.float32)
    scale_p = _pad_to(scale.reshape(B, 1, H), (B, 1, H_p)).astype(jnp.float32)

    x_spec = pl.BlockSpec((pl.Squeezed(), TS, Cin_p), lambda b, s: (b, s, 0))
    row_spec = pl.BlockSpec((pl.Squeezed(), 1, H_p), lambda b, s: (b, 0, 0))
    out_spec = pl.BlockSpec((pl.Squeezed(), TS, Cout_p), lambda b, s: (b, s, 0))
    const2d = lambda a: pl.BlockSpec(a.shape, lambda b, s: (0, 0))

    md_bytes = jnp.dtype(matmul_dtype).itemsize
    cost = pl.CostEstimate(
        flops=2 * B * S_p * (Cin_p * H_p + H_p * Cout_p),
        transcendentals=B * S_p,  # rsqrt per row
        bytes_accessed=(x_p.size * md_bytes + w1_p.size * md_bytes
                        + wo_p.size * md_bytes
                        + (b1_p.size + bo_p.size + shift_p.size + scale_p.size) * 4
                        + B * S_p * Cout_p * jnp.dtype(x.dtype).itemsize),
    )

    kernel = functools.partial(_modulated_mlp_kernel, eps=eps, h_true=H)
    out_p = pl.pallas_call(
        kernel,
        out_shape=jax.ShapeDtypeStruct((B, S_p, Cout_p), x.dtype),
        grid_spec=pltpu.PrefetchScalarGridSpec(
            num_scalar_prefetch=0,
            grid=(B, S_p // TS),
            in_specs=[
                x_spec,              # x
                row_spec, row_spec,  # shift, scale
                const2d(w1_p), const2d(b1_p),
                const2d(wo_p), const2d(bo_p),
            ],
            out_specs=out_spec,
        ),
        compiler_params=pltpu.CompilerParams(
            dimension_semantics=("parallel", "parallel"),
            vmem_limit_bytes=32 * 1024 * 1024),
        cost_estimate=cost,
    )(x_p, shift_p, scale_p, w1_p, b1_p, wo_p, bo_p)

    return out_p[:, :S, :Cout]


def modulated_mlp_ref(x, c, params, eps=1e-6, matmul_dtype=jnp.float32):
    """Pure-JAX reference mirroring the PyTorch forward (operand dtype configurable)."""
    md = matmul_dtype
    h = jnp.dot(x.astype(md), params["w1"].astype(md),
                preferred_element_type=jnp.float32) + params["b1"]
    c2 = c.reshape(c.shape[0], -1)
    cm = c2 @ params["wc"] + params["bc"]
    cm = cm * jax.nn.sigmoid(cm)
    mod = cm @ params["wm"] + params["bm"]
    H = mod.shape[-1] // 2
    shift, scale = mod[:, :H], mod[:, H:]
    mean = jnp.mean(h, axis=-1, keepdims=True)
    var = jnp.mean(jnp.square(h - mean), axis=-1, keepdims=True)
    hn = (h - mean) * jax.lax.rsqrt(var + eps)
    hm = hn * (1.0 + scale[:, None, :]) + shift[:, None, :]
    return jnp.dot(hm.astype(md), params["wo"].astype(md),
                   preferred_element_type=jnp.float32) + params["bo"]


if __name__ == "__main__":
    # Small shapes consistent with the module (S = flattened middle dims).
    B, S = 2, 16
    IN_CH, HIDDEN, COND_CH, OUT_CH = 4, 32, 64, 3

    key = jax.random.PRNGKey(0)
    keys = jax.random.split(key, 10)

    params = {
        "w1": 0.1 * jax.random.normal(keys[0], (IN_CH, HIDDEN), jnp.float32),
        "b1": 0.1 * jax.random.normal(keys[1], (HIDDEN,), jnp.float32),
        "wc": 0.1 * jax.random.normal(keys[2], (COND_CH, HIDDEN), jnp.float32),
        "bc": 0.1 * jax.random.normal(keys[3], (HIDDEN,), jnp.float32),
        "wm": 0.1 * jax.random.normal(keys[4], (HIDDEN, 2 * HIDDEN), jnp.float32),
        "bm": 0.1 * jax.random.normal(keys[5], (2 * HIDDEN,), jnp.float32),
        "wo": 0.1 * jax.random.normal(keys[6], (HIDDEN, OUT_CH), jnp.float32),
        "bo": 0.1 * jax.random.normal(keys[7], (OUT_CH,), jnp.float32),
    }

    x = jax.random.normal(keys[8], (B, S, IN_CH), jnp.float32)
    c = jax.random.normal(keys[9], (B, 1, COND_CH), jnp.float32)

    ref = modulated_mlp_ref(x, c, params)  # f32 reference

    # Exact-path check: f32 matmul operands, tight tolerance.
    out_f32 = modulated_mlp_pallas(x, c, params, matmul_dtype=jnp.float32)
    out_f32 = jax.block_until_ready(out_f32)
    assert out_f32.shape == (B, S, OUT_CH), out_f32.shape
    assert jnp.allclose(out_f32, ref, atol=1e-4, rtol=1e-4), \
        float(jnp.max(jnp.abs(out_f32 - ref)))

    # Performance path: bf16 MXU operands, f32 accumulation; looser tolerance.
    out_bf16 = modulated_mlp_pallas(x, c, params)  # default matmul_dtype=bf16
    out_bf16 = jax.block_until_ready(out_bf16)
    assert out_bf16.shape == (B, S, OUT_CH), out_bf16.shape
    assert jnp.allclose(out_bf16, ref, atol=5e-2, rtol=5e-2), \
        float(jnp.max(jnp.abs(out_bf16 - ref)))

    print("KERNEL_OK")
</pallas_src>

<mosaic_0001>
module attributes {stable_mosaic.version = 11 : i64} {
  func.func @_modulated_mlp_kernel(%arg0: i32, %arg1: i32, %arg2: memref<1x16x128xf32, #tpu.memory_space<vmem>>, %arg3: memref<1x1x128xf32, #tpu.memory_space<vmem>>, %arg4: memref<1x1x128xf32, #tpu.memory_space<vmem>>, %arg5: memref<128x128xf32, #tpu.memory_space<vmem>>, %arg6: memref<1x128xf32, #tpu.memory_space<vmem>>, %arg7: memref<128x128xf32, #tpu.memory_space<vmem>>, %arg8: memref<1x128xf32, #tpu.memory_space<vmem>>, %arg9: memref<1x16x128xf32, #tpu.memory_space<vmem>>) attributes {dimension_semantics = [#tpu.dimension_semantics<parallel>, #tpu.dimension_semantics<parallel>], iteration_bounds = array<i64: 2, 1>, scalar_prefetch = 0 : i64, scratch_operands = 0 : i64, tpu.core_type = #tpu.core_type<tc>, window_params = [{transform_indices = @transform_0, window_bounds = array<i64: 1, 16, 128>}, {transform_indices = @transform_1, window_bounds = array<i64: 1, 1, 128>}, {transform_indices = @transform_2, window_bounds = array<i64: 1, 1, 128>}, {pipeline_mode = #tpu.pipeline_mode<synchronous>, transform_indices = @transform_3, window_bounds = array<i64: 128, 128>}, {pipeline_mode = #tpu.pipeline_mode<synchronous>, transform_indices = @transform_4, window_bounds = array<i64: 1, 128>}, {pipeline_mode = #tpu.pipeline_mode<synchronous>, transform_indices = @transform_5, window_bounds = array<i64: 128, 128>}, {pipeline_mode = #tpu.pipeline_mode<synchronous>, transform_indices = @transform_6, window_bounds = array<i64: 1, 128>}, {transform_indices = @transform_7, window_bounds = array<i64: 1, 16, 128>}]} {
    %c0 = arith.constant 0 : index
    %c0_0 = arith.constant 0 : index
    %c0_1 = arith.constant 0 : index
    %0 = vector.load %arg2[%c0, %c0_0, %c0_1] : memref<1x16x128xf32, #tpu.memory_space<vmem>>, vector<1x16x128xf32>
    %1 = vector.shape_cast %0 : vector<1x16x128xf32> to vector<16x128xf32>
    %c0_2 = arith.constant 0 : index
    %c0_3 = arith.constant 0 : index
    %2 = vector.load %arg5[%c0_2, %c0_3] : memref<128x128xf32, #tpu.memory_space<vmem>>, vector<128x128xf32>
    %cst = arith.constant dense<0.000000e+00> : vector<16x128xf32>
    %3 = tpu.matmul %1, %2, %cst {dimension_numbers = #tpu.dot_dimension_numbers<[1], [0], [0], [1], [0, 0, 1, 1], [], []>} : vector<16x128xf32>, vector<128x128xf32>, vector<16x128xf32> -> vector<16x128xf32>
    %c0_4 = arith.constant 0 : index
    %c0_5 = arith.constant 0 : index
    %4 = vector.load %arg6[%c0_4, %c0_5] : memref<1x128xf32, #tpu.memory_space<vmem>>, vector<1x128xf32>
    %5 = vector.broadcast %4 : vector<1x128xf32> to vector<16x128xf32>
    %6 = arith.addf %3, %5 : vector<16x128xf32>
    %cst_6 = arith.constant dense<0.000000e+00> : vector<16xf32>
    %7 = vector.multi_reduction <add>, %6, %cst_6 [1] : vector<16x128xf32> to vector<16xf32>
    %8 = vector.shape_cast %7 : vector<16xf32> to vector<16x1xf32>
    %cst_7 = arith.constant 3.125000e-02 : f32
    %9 = vector.broadcast %cst_7 : f32 to vector<16x1xf32>
    %10 = arith.mulf %8, %9 : vector<16x1xf32>
    %11 = vector.broadcast %10 : vector<16x1xf32> to vector<16x128xf32>
    %12 = arith.subf %6, %11 : vector<16x128xf32>
    %13 = tpu.iota {dimensions = array<i32: 1>} : vector<1x128xi32>
    %c32_i32 = arith.constant 32 : i32
    %14 = vector.broadcast %c32_i32 : i32 to vector<1x128xi32>
    %15 = arith.cmpi slt, %13, %14 : vector<1x128xi32>
    %16 = arith.extui %15 : vector<1x128xi1> to vector<1x128xi32>
    %17 = arith.sitofp %16 : vector<1x128xi32> to vector<1x128xf32>
    %18 = vector.broadcast %17 : vector<1x128xf32> to vector<16x128xf32>
    %19 = arith.mulf %12, %18 : vector<16x128xf32>
    %20 = arith.mulf %19, %19 : vector<16x128xf32>
    %cst_8 = arith.constant dense<0.000000e+00> : vector<16xf32>
    %21 = vector.multi_reduction <add>, %20, %cst_8 [1] : vector<16x128xf32> to vector<16xf32>
    %22 = vector.shape_cast %21 : vector<16xf32> to vector<16x1xf32>
    %cst_9 = arith.constant 3.125000e-02 : f32
    %23 = vector.broadcast %cst_9 : f32 to vector<16x1xf32>
    %24 = arith.mulf %22, %23 : vector<16x1xf32>
    %cst_10 = arith.constant 9.99999997E-7 : f32
    %25 = vector.broadcast %cst_10 : f32 to vector<16x1xf32>
    %26 = arith.addf %24, %25 : vector<16x1xf32>
    %27 = math.rsqrt %26 : vector<16x1xf32>
    %28 = vector.broadcast %27 : vector<16x1xf32> to vector<16x128xf32>
    %29 = arith.mulf %19, %28 : vector<16x128xf32>
    %c0_11 = arith.constant 0 : index
    %c0_12 = arith.constant 0 : index
    %c0_13 = arith.constant 0 : index
    %30 = vector.load %arg4[%c0_11, %c0_12, %c0_13] : memref<1x1x128xf32, #tpu.memory_space<vmem>>, vector<1x1x128xf32>
    %31 = vector.shape_cast %30 : vector<1x1x128xf32> to vector<1x128xf32>
    %cst_14 = arith.constant 1.000000e+00 : f32
    %32 = vector.broadcast %cst_14 : f32 to vector<1x128xf32>
    %33 = arith.addf %32, %31 : vector<1x128xf32>
    %34 = vector.broadcast %33 : vector<1x128xf32> to vector<16x128xf32>
    %35 = arith.mulf %29, %34 : vector<16x128xf32>
    %c0_15 = arith.constant 0 : index
    %c0_16 = arith.constant 0 : index
    %c0_17 = arith.constant 0 : index
    %36 = vector.load %arg3[%c0_15, %c0_16, %c0_17] : memref<1x1x128xf32, #tpu.memory_space<vmem>>, vector<1x1x128xf32>
    %37 = vector.shape_cast %36 : vector<1x1x128xf32> to vector<1x128xf32>
    %38 = vector.broadcast %37 : vector<1x128xf32> to vector<16x128xf32>
    %39 = arith.addf %35, %38 : vector<16x128xf32>
    %c0_18 = arith.constant 0 : index
    %c0_19 = arith.constant 0 : index
    %40 = vector.load %arg7[%c0_18, %c0_19] : memref<128x128xf32, #tpu.memory_space<vmem>>, vector<128x128xf32>
    %cst_20 = arith.constant dense<0.000000e+00> : vector<16x128xf32>
    %41 = tpu.matmul %39, %40, %cst_20 {dimension_numbers = #tpu.dot_dimension_numbers<[1], [0], [0], [1], [0, 0, 1, 1], [], []>} : vector<16x128xf32>, vector<128x128xf32>, vector<16x128xf32> -> vector<16x128xf32>
    %c0_21 = arith.constant 0 : index
    %c0_22 = arith.constant 0 : index
    %42 = vector.load %arg8[%c0_21, %c0_22] : memref<1x128xf32, #tpu.memory_space<vmem>>, vector<1x128xf32>
    %43 = vector.broadcast %42 : vector<1x128xf32> to vector<16x128xf32>
    %44 = arith.addf %41, %43 : vector<16x128xf32>
    %c0_23 = arith.constant 0 : index
    %c0_24 = arith.constant 0 : index
    %c0_25 = arith.constant 0 : index
    %45 = vector.load %arg9[%c0_23, %c0_24, %c0_25] : memref<1x16x128xf32, #tpu.memory_space<vmem>>, vector<1x16x128xf32>
    %46 = vector.shape_cast %45 : vector<1x16x128xf32> to vector<16x128xf32>
    %47 = vector.shape_cast %44 : vector<16x128xf32> to vector<1x16x128xf32>
    tpu.vector_store %arg9[%c0_23, %c0_24, %c0_25], %47 {strides = array<i32>} : memref<1x16x128xf32, #tpu.memory_space<vmem>>, vector<1x16x128xf32>,
    return
  }
  func.func @transform_0(%arg0: i32, %arg1: i32) -> (i32, i32, i32) {
    %c0_i32 = arith.constant 0 : i32
    %c0_i32_0 = arith.constant 0 : i32
    return %arg0, %arg1, %c0_i32 : i32, i32, i32
  }
  func.func @transform_1(%arg0: i32, %arg1: i32) -> (i32, i32, i32) {
    %c0_i32 = arith.constant 0 : i32
    %c0_i32_0 = arith.constant 0 : i32
    %c0_i32_1 = arith.constant 0 : i32
    return %arg0, %c0_i32, %c0_i32_0 : i32, i32, i32
  }
  func.func @transform_2(%arg0: i32, %arg1: i32) -> (i32, i32, i32) {
    %c0_i32 = arith.constant 0 : i32
    %c0_i32_0 = arith.constant 0 : i32
    %c0_i32_1 = arith.constant 0 : i32
    return %arg0, %c0_i32, %c0_i32_0 : i32, i32, i32
  }
  func.func @transform_3(%arg0: i32, %arg1: i32) -> (i32, i32) {
    %c0_i32 = arith.constant 0 : i32
    %c0_i32_0 = arith.constant 0 : i32
    %c0_i32_1 = arith.constant 0 : i32
    return %c0_i32, %c0_i32_0 : i32, i32
  }
  func.func @transform_4(%arg0: i32, %arg1: i32) -> (i32, i32) {
    %c0_i32 = arith.constant 0 : i32
    %c0_i32_0 = arith.constant 0 : i32
    %c0_i32_1 = arith.constant 0 : i32
    return %c0_i32, %c0_i32_0 : i32, i32
  }
  func.func @transform_5(%arg0: i32, %arg1: i32) -> (i32, i32) {
    %c0_i32 = arith.constant 0 : i32
    %c0_i32_0 = arith.constant 0 : i32
    %c0_i32_1 = arith.constant 0 : i32
    return %c0_i32, %c0_i32_0 : i32, i32
  }
  func.func @transform_6(%arg0: i32, %arg1: i32) -> (i32, i32) {
    %c0_i32 = arith.constant 0 : i32
    %c0_i32_0 = arith.constant 0 : i32
    %c0_i32_1 = arith.constant 0 : i32
    return %c0_i32, %c0_i32_0 : i32, i32
  }
  func.func @transform_7(%arg0: i32, %arg1: i32) -> (i32, i32, i32) {
    %c0_i32 = arith.constant 0 : i32
    %c0_i32_0 = arith.constant 0 : i32
    return %arg0, %arg1, %c0_i32 : i32, i32, i32
  }
}

</mosaic_0001>

<bundles_post_ra>
// kernel: tpu_custom_call.1
= control target key start
LH: loop header
LB: loop body
LE: loop exit
PB: predicated region body
PF: predicated region fallthrough
CT: control target
= control target key end

     0   :  { %12 = vsyncpa [#allocation3], 0  ;;  %s1558_s0 = inlined_call_operand.hbm [shape: f32[2,16,128], index: 0, kind: input, shape index: {}]   ;;  %s1559_s1 = inlined_call_operand.vmem [shape: f32[2,1,128], index: 1, kind: input, shape index: {}]   ;;  %s1560_s2 = inlined_call_operand.vmem [shape: f32[2,1,128], index: 2, kind: input, shape index: {}]   ;;  %s1561_s3 = inlined_call_operand.hbm [shape: f32[128,128], index: 3, kind: input, shape index: {}]   ;;  %s1562_s4 = inlined_call_operand.vmem [shape: f32[1,128], index: 4, kind: input, shape index: {}]   ;;  %s1563_s5 = inlined_call_operand.hbm [shape: f32[128,128], index: 5, kind: input, shape index: {}]   ;;  %s1564_s6 = inlined_call_operand.vmem [shape: f32[1,128], index: 6, kind: input, shape index: {}]   ;;  %s1565_s7 = inlined_call_operand.hbm [shape: f32[2,16,128], index: 7, kind: output, shape index: {}]  }
   0x1   :  { %14 = vsyncpa [#allocation3 + $0x1], 0 }
   0x2   :  { %15 = vsyncpa [#allocation6], 0 }
   0x3   :  { %16 = vsyncpa [#allocation4], 0 }
   0x4   :  { %18 = vsyncpa [#allocation4 + $0x1], 0  ;;  %s1272_s24 = smov 0   ;;  %s1274_s25 = smov 0  }
   0x5   :  { %s1276_s26 = smov 0   ;;  %s1278_s27 = smov 0  }
   0x6   :  { %s1280_s28 = smov 0   ;;  %s1282_s29 = smov 0  }
   0x7 LB: > { %1573 = sst [smem:[#allocation12_spill]] %s1201_s24  ;;  %s762_s30 = sadd.s32 4294967295, %s1221_s29   ;;  %s1221_s29 = sphi %s1282_s29, %s24_s29   ;;  %s1217_s28 = sphi %s1280_s28, %s1595_s28   ;;  %s1213_s27 = sphi %s1278_s27, %s1594_s27   ;;  %s1209_s26 = sphi %s1276_s26, %s1593_s26   ;;  %s1205_s25 = sphi %s1274_s25, %s1592_s25   ;;  %s1201_s24 = sphi %s1272_s24, %s1591_s24  }
   0x8   : > { %s763_s8 = sadd.s32 4294967294, %s1221_s29   ;;  %p58_p0 = scmp.ne.s32.totalorder %s1205_s25, %s1201_s24 }
   0x9   : > { %p1306_p1 = scmp.eq.s32.totalorder %s762_s30, 0  ;;  %p1310_p2 = scmp.eq.s32.totalorder %s762_s30, 1 }
   0xa   : > { %p226_p3 = scmp.eq.s32.totalorder %s763_s8, 1  ;;  %p764_p5 = scmp.ge.s32.totalorder %s1221_s29, 1 }
   0xb   : > { %s1574_s9 = scalar_select %p1306_p1, 1, 0 }
   0xc   : > { %p1316_p4 = por %p1306_p1, %p58_p0  ;;  %p1321_p6 = por %p226_p3, %p58_p0 }
   0xd   : > { %p233_p7 = scmp.lt.s32.totalorder %s1221_s29, 3  ;;  %s1223_s14 = smov [#allocation5]  }
   0xe   : > { %s1576_s11 = scalar_select %p1316_p4, 1, 0 }
   0xf   : > { %s1577_s12 = scalar_select %p1321_p6, 1, 0 }
  0x10   : > { %p1326_p8 = pnand %p764_p5, %p233_p7  ;;  %s245_s15 = sshll.u32 %s1223_s14, 4  ;;  %s1330_s15 = int_to_ptr.vmem [resolvable:$true] %s245_s15 }
  0x11   : > { %1578 = sst [smem:[#allocation13_spill]] %s1577_s12  ;;  %s1224_s17 = smov [#allocation7]  }
  0x12   : > { %p969_p9 = pneg %p1326_p8  ;;  %s261_s18 = sshll.u32 %s1224_s17, 4  ;;  %s1341_s18 = int_to_ptr.vmem [resolvable:$true] %s261_s18 }
  0x13   : > { %s1049_s21 = scalar_lea.hbm %s1561_s3, 2048 }
  0x14   : > { %p1337_p11 = pnand %p969_p9, %p1306_p1  ;;  %p1050_p12 = scmp.ne.s32.totalorder %s1561_s3, %s1049_s21 }
  0x15   : > { %p1056_p5 = scmp.lt.u32.totalorder %s1049_s21, %s1561_s3 }
  0x16   : > { %p1051_p13 = pneg %p1337_p11 }
  0x18   : > { %p1052_p0 = pnand %p1051_p13, %p1050_p12 }
  0x1a   : > { %p1053_p3 = pneg %p1052_p0 }
  0x1c   : > { %p1058_p7 = pnand %p1056_p5, %p1053_p3 }
  0x1e   : > { %1061 = shalt.err (!%p1058_p7)
}
  0x1f   : > { %s1062_s14 = scalar_lea.vmem %s1330_s15, 2048  ;;  %p1070_p1 = scmp.lt.s32.totalorder %s1330_s15, %s1330_s15 }
  0x20   : > { %p1063_p9 = scmp.ne.s32.totalorder %s1330_s15, %s1062_s14  ;;  %p1071_p12 = scmp.lt.s32.totalorder %s1062_s14, %s1062_s14 }
  0x22   : > { %p1065_p10 = pnand %p1063_p9, %p1051_p13  ;;  %p1072_p0 = por %p1071_p12, %p1070_p1 }
  0x24   : > { %p1066_p6 = pneg %p1065_p10 }
  0x26   : > { %p1073_p4 = pnand %p1072_p0, %p1066_p6 }
  0x28   : > { %1076 = shalt.err (!%p1073_p4)
}
  0x29   : > { %s1571_s17 = smov 128   ;;  %s1226_s19 = smov 8  }
  0x2a   : > { %972 = dma.hbm_to_vmem [thread:$0]  (!%p1337_p11), %s1561_s3, 2048, %s1330_s15, [#allocation6], %s1571_s17, %s1571_s17, %s1226_s19  }
  0x2b   : > { %s1077_s30 = scalar_lea.hbm %s1563_s5, 2048 }
  0x2c   : > { %p1078_p1 = scmp.ne.s32.totalorder %s1563_s5, %s1077_s30  ;;  %p1084_p10 = scmp.lt.u32.totalorder %s1077_s30, %s1563_s5 }
  0x2e   : > { %p1080_p4 = pnand %p1078_p1, %p1051_p13 }
  0x30   : > { %p1081_p6 = pneg %p1080_p4 }
  0x32   : > { %p1086_p3 = pnand %p1084_p10, %p1081_p6 }
  0x34   : > { %1089 = shalt.err (!%p1086_p3)
}
  0x35   : > { %s1090_s15 = scalar_lea.vmem %s1341_s18, 2048  ;;  %p1098_p12 = scmp.lt.s32.totalorder %s1341_s18, %s1341_s18 }
  0x36   : > { %p1091_p5 = scmp.ne.s32.totalorder %s1341_s18, %s1090_s15  ;;  %p1099_p0 = scmp.lt.s32.totalorder %s1090_s15, %s1090_s15 }
  0x38   : > { %p1093_p7 = pnand %p1091_p5, %p1051_p13  ;;  %p1100_p1 = por %p1099_p0, %p1098_p12 }
  0x3a   : > { %p1094_p9 = pneg %p1093_p7 }
  0x3c   : > { %p1101_p4 = pnand %p1100_p1, %p1094_p9 }
  0x3e   : > { %1104 = shalt.err (!%p1101_p4)
}
  0x3f   : > { %975 = dma.hbm_to_vmem [thread:$0]  (!%p1337_p11), %s1563_s5, 2048, %s1341_s18, [#allocation6], %s1571_s17, %s1571_s17, %s1226_s19  }
  0x40   : > { %s36_s16 = sadd.s32 1, %s1217_s28  ;;  %s45_s20 = sadd.s32 1, %s1209_s26 }
  0x41   : > { %p38_p13 = scmp.ge.s32.totalorder %s36_s16, 2  ;;  %p52_p6 = scmp.ne.s32.totalorder %s1209_s26, %s1205_s25 }
  0x42   : > { %p53_p10 = scmp.eq.s32.totalorder %s1221_s29, 0  ;;  %p986_p3 = scmp.lt.s32.totalorder %s1221_s29, 2 }
  0x43   : > { %s1597_s16 = smov (%p38_p13, %s36_s16), 0  ;;  %p1411_p7 = por %p1310_p2, %p52_p6 }
  0x44   : > { %p54_p5 = por %p53_p10, %p52_p6  ;;  %s40_s22 = ssub.s32 %s1217_s28, %s1597_s16 }
  0x45   : > { %s1581_s21 = scalar_select %p1411_p7, 1, 0 }
  0x46   : > { %s278_s23 = sand.u32 1, %s1209_s26   ;;  %p43_p9 = scmp.eq.s32.totalorder %s40_s22, 0 }
  0x47   : > { %s768_s18 = sshll.u32 %s278_s23, 4  ;;  %s785_s30 = sshll.u32 %s1217_s28, 8 }
  0x48   : > { %s1420_s8 = scalar_select %p43_p9, %s1209_s26, %s45_s20  }
  0x49   : > { %s1425_s24 = scalar_lea.hbm %s1558_s0, %s785_s30  ;;  %s282_s10 = scalar_lea.vmem [#allocation2], %s768_s18 }
  0x4a   : > { %s291_s12 = sshll.u32 %s282_s10, 4  ;;  %p1429_p2 = pnand %p986_p3, %p54_p5  ;;  %s1433_s12 = int_to_ptr.vmem [resolvable:$true] %s291_s12 }
  0x4b   : > { %s1435_s20 = scalar_lea.sflag [#allocation3], %s278_s23  ;;  %s1105_s22 = scalar_lea.hbm %s1425_s24, 256 }
  0x4c   : > { %p1106_p11 = scmp.ne.s32.totalorder %s1425_s24, %s1105_s22  ;;  %p1107_p12 = pneg %p1429_p2 }
  0x4d   : > { %s1110_s14 = scalar_lea.hbm %s1558_s0, 512  ;;  %p1111_p4 = scmp.lt.u32.totalorder %s1425_s24, %s1558_s0 }
  0x4e   : > { %p1108_p0 = pnand %p1107_p12, %p1106_p11  ;;  %p1112_p13 = scmp.lt.u32.totalorder %s1110_s14, %s1105_s22 }
  0x4f   : > { %p1114_p10 = scmp.lt.u32.totalorder %s1105_s22, %s1425_s24 }
  0x50   : > { %p1109_p1 = pneg %p1108_p0  ;;  %p1113_p6 = por %p1112_p13, %p1111_p4 }
  0x52   : > { %p1115_p3 = por %p1114_p10, %p1113_p6 }
  0x54   : > { %p1116_p5 = pnand %p1115_p3, %p1109_p1 }
  0x56   : > { %1119 = shalt.err (!%p1116_p5)
}
  0x57   : > { %s1120_s23 = scalar_lea.vmem %s1433_s12, 256  ;;  %s1227_s18 = smov [#allocation2]  }
  0x58   : > { %p1121_p9 = scmp.ne.s32.totalorder %s1433_s12, %s1120_s23  ;;  %s1125_s30 = sshll.u32 %s1227_s18, 4  ;;  %s1126_s30 = int_to_ptr.vmem [resolvable:$false] %s1125_s30 }
  0x59   : > { %s1127_s15 = scalar_lea.vmem %s1126_s30, 512  ;;  %p1128_p7 = scmp.lt.s32.totalorder %s1433_s12, %s1126_s30 }
  0x5a   : > { %p1123_p11 = pnand %p1121_p9, %p1107_p12  ;;  %p1129_p4 = scmp.lt.s32.totalorder %s1127_s15, %s1120_s23 }
  0x5c   : > { %p1124_p0 = pneg %p1123_p11  ;;  %p1130_p13 = por %p1129_p4, %p1128_p7 }
  0x5e   : > { %p1131_p6 = pnand %p1130_p13, %p1124_p0 }
  0x60   : > { %1134 = shalt.err (!%p1131_p6)
}
  0x61   : > { %s1583_s22 = smov 128   ;;  %315 = sbr.rel (%p1326_p8) target bundleno = 905 (0x389), region = 48 }
  0x62   : > { %979 = dma.hbm_to_vmem [thread:$0]  (!%p1429_p2), %s1425_s24, 256, %s1433_s12, %s1435_s20, %s1583_s22, %s1583_s22, %s1226_s19  }
  0x63   : > { %s1469_s14 = sand.u32 (!%p1326_p8), 1, %s1205_s25   ;;  %p1584_p7 = scmp.ne.s32.totalorder (!%p1326_p8), %s1576_s11, 0 }
  0x64   : > { %s772_s10 = sshll.u32 (!%p1326_p8), %s1469_s14, 4  ;;  %s318_s23 = scalar_lea.sflag (!%p1326_p8), [#allocation3], %s1469_s14 }
  0x65   : > { %s1475_s17 = scalar_lea.vmem (!%p1326_p8), [#allocation2], %s772_s10 }
  0x68   : > { %1188 = dma.done.wait (%p1584_p7), %s318_s23, 256  }
  0x69   : > { %1190 = vsyncadd (%p1584_p7), %s318_s23, 4294967040  ;;  %p1585_p2 = scmp.ne.s32.totalorder %s1574_s9, 0 }
  0x6b   : > { %1192 = dma.done.wait (%p1585_p2), [#allocation6], 4096  }
  0x6c   : > { %1194 = vsyncadd (%p1585_p2), [#allocation6], 4294963200  ;;  %v376_v0 = vld [vmem:[#allocation5] sm:$0xff]  ;;  %v377_v1 = vld [vmem:[#allocation5 + $0x8] sm:$0xff]  ;;  %v482_v37 = vlaneseq  ;;  %v1228_v41 = vmov 0.0   ;;  %p367_p8 = scmp.lt.s32.totalorder %s1213_s27, 1 }
  0x6d   : > { %v378_v2 = vld [vmem:[#allocation5 + $0x10] sm:$0xff]  ;;  %v893_v3 = vpack.c.bf16 %v377_v1, %v376_v0  ;;  %v379_v4 = vld [vmem:[#allocation5 + $0x18] sm:$0xff]  ;;  %v380_v6 = vld [vmem:[#allocation5 + $0x20] sm:$0xff]  ;;  %s365_s15 = scalar_lea.vmem [#allocation8], %s772_s10  ;;  %s786_s9 = sshll.u32 %s1213_s27, 8 }
  0x6e   : > { %v897_v5 = vpack.c.bf16 %v379_v4, %v378_v2  ;;  %v381_v7 = vld [vmem:[#allocation5 + $0x28] sm:$0xff]  ;;  %v374_v9 = vld [vmem:[%s1475_s17] sm:$0xff]  ;;  %v383_v11 = vld [vmem:[#allocation5 + $0x38] sm:$0xff]  ;;  %v483_v38 = vand.u32 127, %v482_v37  ;;  %s368_s13 = scalar_select %p367_p8, %s1213_s27, 1 }
  0x6f   : > { %894 = vmatprep.subr.bf16.mxu0 %v893_v3  ;;  %v901_v8 = vpack.c.bf16 %v381_v7, %v380_v6  ;;  %v382_v10 = vld [vmem:[#allocation5 + $0x30] sm:$0xff]  ;;  %855 = vmatprep.mubr.f32.mxu0 %v374_v9  ;;  %v384_v13 = vld [vmem:[#allocation5 + $0x40] sm:$0xff]  ;;  %v385_v14 = vld [vmem:[#allocation5 + $0x48] sm:$0xff]  ;;  %s638_s22 = sshll.u32 %s365_s15, 4  ;;  %s1509_s19 = scalar_lea.hbm %s1565_s7, %s786_s9  ;;  %s1504_s22 = int_to_ptr.vmem [resolvable:$true] %s638_s22 }
  0x70   : > { %896 = vmatpush3.bf16.msra.mxu0 %v893_v3  ;;  %v905_v12 = vpack.c.bf16 %v383_v11, %v382_v10  ;;  %v909_v15 = vpack.c.bf16 %v385_v14, %v384_v13  ;;  %v386_v16 = vld [vmem:[#allocation5 + $0x50] sm:$0xff]  ;;  %v387_v17 = vld [vmem:[#allocation5 + $0x58] sm:$0xff]  ;;  %v388_v19 = vld [vmem:[#allocation5 + $0x60] sm:$0xff]  ;;  %vm484_vm0 = vcmp.lt.s32.totalorder %v483_v38, 32  ;;  %s372_s12 = scalar_lea.vmem %s1560_s2, %s368_s13  ;;  %v507_v10 = vshrl.u32 %v482_v37, 7  ;;  %s369_s30 = scalar_lea.vmem %s1559_s1, %s368_s13 }
  0x71   : > { %898 = vmatprep.subr.bf16.mxu0 %v897_v5  ;;  %v913_v18 = vpack.c.bf16 %v387_v17, %v386_v16  ;;  %v389_v20 = vld [vmem:[#allocation5 + $0x68] sm:$0xff]  ;;  %v390_v22 = vld [vmem:[#allocation5 + $0x70] sm:$0xff]  ;;  %v391_v23 = vld [vmem:[#allocation5 + $0x78] sm:$0xff]  ;;  %v777_v42 = vsel %vm484_vm0, 1.0, %v1228_v41  ;;  %s623_s10 = scalar_lea.sflag [#allocation4], %s1469_s14  ;;  %s1135_s24 = scalar_lea.vmem %s1504_s22, 256 }
  0x72   : > { %v917_v21 = vpack.c.bf16 %v389_v20, %v388_v19  ;;  %v921_v24 = vpack.c.bf16 %v391_v23, %v390_v22  ;;  %v375_v25 = vld [vmem:[%s1475_s17 + $0x8] sm:$0xff]  ;;  %v776_v26 = vld [vmem:[%s1562_s4] ss:$0 sm:$0xff]  ;;  %v524_v33 = vld [vmem:[#allocation7 + $0x10] sm:$0xff]  ;;  %v508_v14 = vsub.s32 0, %v507_v10  ;;  %p1136_p12 = scmp.ne.s32.totalorder %s1504_s22, %s1135_s24  ;;  %p1586_p1 = scmp.ne.s32.totalorder %s1581_s21, 0 }
  0x73   : > { %v522_v31 = vld [vmem:[#allocation7] sm:$0xff]  ;;  %v523_v32 = vld [vmem:[#allocation7 + $0x8] sm:$0xff]  ;;  %v525_v35 = vld [vmem:[#allocation7 + $0x18] sm:$0xff]  ;;  %s1229_s27 = smov [#allocation8]  }
  0x74   : > { %900 = vmatpush3.bf16.msra.mxu0 %v897_v5  ;;  %v925_v34 = vpack.c.bf16 %v523_v32, %v522_v31  ;;  %v929_v36 = vpack.c.bf16 %v525_v35, %v524_v33  ;;  %v526_v51 = vld [vmem:[#allocation7 + $0x20] sm:$0xff]  ;;  %v527_v52 = vld [vmem:[#allocation7 + $0x28] sm:$0xff]  ;;  %v528_v54 = vld [vmem:[#allocation7 + $0x30] sm:$0xff]  ;;  %p1137_p10 = pnand %p1136_p12, %p1586_p1 }
  0x75   : > { %902 = vmatprep.subr.bf16.mxu0 %v901_v8  ;;  %v933_v53 = vpack.c.bf16 %v527_v52, %v526_v51  ;;  %v529_v55 = vld [vmem:[#allocation7 + $0x38] sm:$0xff]  ;;  %v530_v57 = vld [vmem:[#allocation7 + $0x40] sm:$0xff]  ;;  %v531_v58 = vld [vmem:[#allocation7 + $0x48] sm:$0xff] }
  0x76   : > { %926 = vmatprep.subr.bf16.mxu1 %v925_v34  ;;  %v937_v56 = vpack.c.bf16 %v529_v55, %v528_v54  ;;  %v941_v59 = vpack.c.bf16 %v531_v58, %v530_v57  ;;  %v532_v60 = vld [vmem:[#allocation7 + $0x50] sm:$0xff]  ;;  %v533_v61 = vld [vmem:[#allocation7 + $0x58] sm:$0xff]  ;;  %v534_v62 = vld [vmem:[#allocation7 + $0x60] sm:$0xff]  ;;  %p1138_p3 = pneg %p1137_p10 }
  0x77   : > { %928 = vmatpush3.bf16.msra.mxu1 %v925_v34  ;;  %v945_v63 = vpack.c.bf16 %v533_v61, %v532_v60  ;;  %v535_v0 = vld [vmem:[#allocation7 + $0x68] sm:$0xff]  ;;  %v536_v2 = vld [vmem:[#allocation7 + $0x70] sm:$0xff]  ;;  %v537_v3 = vld [vmem:[#allocation7 + $0x78] sm:$0xff] }
  0x78   : > { %904 = vmatpush3.bf16.msra.mxu0 %v901_v8  ;;  %930 = vmatprep.subr.bf16.mxu1 %v929_v36  ;;  %v949_v1 = vpack.c.bf16 %v535_v0, %v534_v62  ;;  %v953_v4 = vpack.c.bf16 %v537_v3, %v536_v2 }
  0x79   : > { %906 = vmatprep.subr.bf16.mxu0 %v905_v12 }
  0x7b   : > { %932 = vmatpush3.bf16.msra.mxu1 %v929_v36 }
  0x7c   : > { %908 = vmatpush3.bf16.msra.mxu0 %v905_v12  ;;  %934 = vmatprep.subr.bf16.mxu1 %v933_v53  ;;  %v503_v12 = vld [vmem:[%s372_s12] sm:$0x1]  ;;  %s1139_s12 = sshll.u32 %s1229_s27, 4  ;;  %s1140_s12 = int_to_ptr.vmem [resolvable:$false] %s1139_s12 }
  0x7d   : > { %910 = vmatprep.subr.bf16.mxu0 %v909_v15  ;;  %v504_v13 = vadd.f32 1.0, %v503_v12  ;;  %s1141_s20 = scalar_lea.vmem %s1140_s12, 512  ;;  %p1142_p5 = scmp.lt.s32.totalorder %s1504_s22, %s1140_s12 }
  0x7e   : > { %p1143_p9 = scmp.lt.s32.totalorder %s1141_s20, %s1135_s24 }
  0x7f   : > { %936 = vmatpush3.bf16.msra.mxu1 %v933_v53 }
  0x80   : > { %912 = vmatpush3.bf16.msra.mxu0 %v909_v15  ;;  %938 = vmatprep.subr.bf16.mxu1 %v937_v56  ;;  %v509_v15 = vrot.slane %v504_v13, %v508_v14  ;;  %p1144_p11 = por %p1143_p9, %p1142_p5 }
  0x81   : > { %914 = vmatprep.subr.bf16.mxu0 %v913_v18 }
  0x82   : > { %p1145_p0 = pnand %p1144_p11, %p1138_p3 }
  0x83   : > { %940 = vmatpush3.bf16.msra.mxu1 %v937_v56 }
  0x84   : > { %916 = vmatpush3.bf16.msra.mxu0 %v913_v18  ;;  %942 = vmatprep.subr.bf16.mxu1 %v941_v59  ;;  %v778_v18 = vld [vmem:[%s369_s30] ss:$0 sm:$0xff] }
  0x85   : > { %918 = vmatprep.subr.bf16.mxu0 %v917_v21 }
  0x87   : > { %944 = vmatpush3.bf16.msra.mxu1 %v941_v59 }
  0x88   : > { %920 = vmatpush3.bf16.msra.mxu0 %v917_v21  ;;  %946 = vmatprep.subr.bf16.mxu1 %v945_v63 }
  0x89   : > { %922 = vmatprep.subr.bf16.mxu0 %v921_v24 }
  0x8b   : > { %948 = vmatpush3.bf16.msra.mxu1 %v945_v63 }
  0x8c   : > { %924 = vmatpush3.bf16.msra.mxu0 %v921_v24  ;;  %950 = vmatprep.subr.bf16.mxu1 %v949_v1 }
  0x8f   : > { %856 = vmatmul.mubr.f32.vlgmr.msra.gmra.mrb[0].mxu0 %v375_v25  ;;  %952 = vmatpush3.bf16.msra.mxu1 %v949_v1  ;;  %v779_v25 = vld [vmem:[%s1564_s6] ss:$0 sm:$0xff] }
  0x90   : > { %954 = vmatprep.subr.bf16.mxu1 %v953_v4 }
  0x93   : > { %956 = vmatpush3.bf16.msra.mxu1 %v953_v4 }
 0x162   : > { %v857_v27 = vpop.f32.mrb[0].mxu0 }
 0x163   : > { %v465_v28 = vpop.f32.mrb[1].mxu0  ;;  %v471_v30 = vadd.f32 %v857_v27, %v776_v26 }
 0x164   : > { %v466_v29 = vadd.f32 %v776_v26, %v465_v28 }
 0x166   : > { %474 = vadd.xlane.f32.xlu0 %v466_v29 }
 0x16a   : > { %476 = vadd.xlane.f32.xlu0 %v471_v30 }
 0x1f3   : > { %v475_v39 = vpop.xlane.xlu0 %474 }
 0x1f4   : > { %v478_v40 = vmul.f32 0.03125, %v475_v39 }
 0x1f6   : > { %v480_v43 = vsub.f32 %v466_v29, %v478_v40 }
 0x1f7   : > { %v477_v44 = vpop.xlane.xlu0 %476 }
 0x1f8   : > { %v479_v45 = vmul.f32 0.03125, %v477_v44  ;;  %v487_v46 = vmul.f32 %v777_v42, %v480_v43 }
 0x1fa   : > { %v481_v47 = vsub.f32 %v471_v30, %v479_v45  ;;  %v489_v48 = vmul.f32 %v487_v46, %v487_v46 }
 0x1fc   : > { %491 = vadd.xlane.f32.xlu1 %v489_v48  ;;  %v488_v49 = vmul.f32 %v777_v42, %v481_v47 }
 0x1fe   : > { %v490_v50 = vmul.f32 %v488_v49, %v488_v49 }
 0x200   : > { %493 = vadd.xlane.f32.xlu1 %v490_v50 }
 0x289   : > { %v492_v5 = vpop.xlane.xlu1 %491 }
 0x28a   : > { %v495_v6 = vmul.f32 0.03125, %v492_v5 }
 0x28c   : > { %v497_v7 = vadd.f32 1e-06, %v495_v6 }
 0x28d   : > { %v494_v8 = vpop.xlane.xlu1 %493 }
 0x28e   : > { %1045 = vrsqrt.f32 %v497_v7  ;;  %v496_v9 = vmul.f32 0.03125, %v494_v8 }
 0x290   : > { %v498_v11 = vadd.f32 1e-06, %v496_v9 }
 0x292   : > { %1047 = vrsqrt.f32 %v498_v11 }
 0x298   : > { %v1046_v16 = vpop.eup %1045 }
 0x299   : > { %v501_v17 = vmul.f32 %v1046_v16, %v487_v46 }
 0x29b   : > { %v511_v19 = vmul.f32 %v509_v15, %v501_v17 }
 0x29c   : > { %v1048_v20 = vpop.eup %1047 }
 0x29d   : > { %v502_v21 = vmul.f32 %v1048_v20, %v488_v49  ;;  %v520_v22 = vadd.f32 %v778_v18, %v511_v19 }
 0x29f   : > { %v512_v23 = vmul.f32 %v509_v15, %v502_v21  ;;  %890 = vmatprep.mubr.f32.mxu1 %v520_v22 }
 0x2a1   : > { %v521_v24 = vadd.f32 %v778_v18, %v512_v23 }
 0x2a3   : > { %891 = vmatmul.mubr.f32.vlgmr.msra.gmra.mrb[0].mxu1 %v521_v24 }
 0x376   : > { %v892_v26 = vpop.f32.mrb[0].mxu1 }
 0x377   : > { %v617_v27 = vadd.f32 %v892_v26, %v779_v25  ;;  %v611_v28 = vpop.f32.mrb[1].mxu1 }
 0x378   : > { %v612_v29 = vadd.f32 %v779_v25, %v611_v28 }
 0x379   : > { %621 = vst [vmem:[%s365_s15 + $0x8] sm:$0xff] %v617_v27 }
 0x37a   : > { %620 = vst [vmem:[%s365_s15] sm:$0xff] %v612_v29 }
 0x37b   : > { %1148 = shalt.err (!%p1145_p0)
}
 0x37c   : > { %s1149_s18 = scalar_lea.hbm %s1509_s19, 256  ;;  %s1153_s23 = scalar_lea.hbm %s1565_s7, 512 }
 0x37d   : > { %p1150_p4 = scmp.ne.s32.totalorder %s1509_s19, %s1149_s18  ;;  %p1154_p7 = scmp.lt.u32.totalorder %s1509_s19, %s1565_s7 }
 0x37e   : > { %p1155_p2 = scmp.lt.u32.totalorder %s1153_s23, %s1149_s18  ;;  %p1157_p12 = scmp.lt.u32.totalorder %s1149_s18, %s1509_s19 }
 0x37f   : > { %p1151_p13 = pnand %p1150_p4, %p1586_p1 }
 0x380   : > { %p1156_p8 = por %p1155_p2, %p1154_p7 }
 0x381   : > { %p1152_p6 = pneg %p1151_p13 }
 0x382   : > { %p1158_p10 = por %p1157_p12, %p1156_p8 }
 0x384   : > { %p1159_p3 = pnand %p1158_p10, %p1152_p6 }
 0x386   : > { %1162 = shalt.err (!%p1159_p3)
}
 0x387   : > { %s1230_s11 = smov 128   ;;  %s1231_s13 = smov 8  }
 0x388   : > { %967 = dma.vmem_to_hbm [thread:$0]  (%p1586_p1), %s1504_s22, 256, %s1509_s19, %s623_s10, %s1230_s11, %s1230_s11, %s1231_s13  }
 0x389 PF: > { %s1587_s24 = sld [smem:[#allocation12_spill]]  ;;  %s1588_s27 = sld [smem:[#allocation13_spill]] }
 0x38a   : > { %p1590_p9 = scmp.ge.s32.totalorder %s1221_s29, 2 }
 0x38f   : > { %s653_s12 = sand.u32 1, %s1587_s24   ;;  %p1589_p5 = scmp.ne.s32.totalorder %s1588_s27, 0 }
 0x390   : > { %s654_s20 = scalar_lea.sflag [#allocation4], %s653_s12 }
 0x391   : > { %p981_p11 = pnand %p1590_p9, %p1589_p5 }
 0x393   : > { %1196 = dma.done.wait (!%p981_p11), %s654_s20, 256  }
 0x394   : > { %1198 = vsyncadd (!%p981_p11), %s654_s20, 4294967040  ;;  %s24_s29 = sadd.s32 1, %s1221_s29   ;;  %s1591_s24 = smov %s1205_s25 }
 0x395   : > { %p21_p0 = scmp.ge.s32.totalorder %s24_s29, 4   ;;  %s1592_s25 = smov %s1209_s26 }
 0x396   : > { %s1593_s26 = smov %s1420_s8  ;;  %s1594_s27 = smov %s1217_s28 }
 0x397   : > { %s1595_s28 = smov %s1597_s16  ;;  %23 = sbr.rel (!%p21_p0) target bundleno = 7 (0x7), region = 107 }
 0x39e   :  { %659 = vsyncpa [#allocation3], 1 }
 0x39f   :  { %661 = vsyncpa [#allocation3 + $0x1], 1 }
 0x3a0   :  { %662 = vsyncpa [#allocation6], 1 }
 0x3a1   :  { %663 = vsyncpa [#allocation4], 1 }
 0x3a2   :  { %665 = vsyncpa [#allocation4 + $0x1], 1 }

</bundles_post_ra>
